<compile_context>
chip_gen: v7x
topology: tpu7x:2x2x1
jax: 0.10.0
libtpu: 0.0.40
codegen_flags: <defaults>
</compile_context>

<pallas_src>
import functools

import numpy as np
import jax
import jax.numpy as jnp
from jax import lax
from jax.experimental import pallas as pl
from jax.experimental.pallas import tpu as pltpu


def _pair_con_loss_kernel(feats_ref, *out_refs, batch, tile_rows, inv_temp,
                          matmul_dtype, return_pairs):
    b = batch
    n2 = 2 * b
    tm = tile_rows

    if return_pairs:
        neg_ref, pos_ref, stats_ref = out_refs
    else:
        (stats_ref,) = out_refs

    i = pl.program_id(0)
    r0 = pl.multiple_of(i * tm, 8)                    # first global row of tile

    # Tiles never straddle the f1/f2 boundary (tm divides B), so the row index
    # within a half and the positive-partner row offset are scalar selects.
    in_first = r0 < b
    r0_local = jnp.where(in_first, r0, r0 - b)        # row index within its half
    p0 = pl.multiple_of(jnp.where(in_first, r0 + b, r0 - b), 8)

    q = feats_ref[pl.ds(r0, tm), :]                   # (tm, D), matmul dtype
    partner = feats_ref[pl.ds(p0, tm), :]             # (tm, D) positive partners

    # Fold 1/T into the q operand once: a (tm, D) multiply instead of a
    # (tm, 2B) multiply on sim, and it covers pos_t for free.
    qf = q.astype(jnp.float32) * inv_temp             # (tm, D) f32, pre-scaled

    # Positive pairs: exp(sum(f1*f2)/T), elementwise parity with the reference.
    pos_t = jnp.exp(jnp.sum(qf * partner.astype(jnp.float32),
                            axis=-1, keepdims=True))  # (tm, 1)

    # Row block of exp(feats @ feats.T / T): MXU matmul in A.B^T form.  The
    # resident feats block is already in the matmul dtype (cast in the
    # wrapper), so no per-tile cast of the full (2B, D) block.
    sim = lax.dot_general(
        qf.astype(matmul_dtype), feats_ref[...],
        dimension_numbers=(((1,), (1,)), ((), ())),
        preferred_element_type=jnp.float32)           # (tm, 2B) f32
    e = jnp.exp(sim)

    k = r0_local + lax.broadcasted_iota(jnp.int32, (tm, 1), 0)    # (tm, 1)

    if return_pairs:
        # Fused masked_select(...).view(2B, 2B-2): row (r0+t) drops columns k
        # and k+B (k = row index mod B); close the gaps by a per-row choice
        # between the row shifted left by 0, 1 or 2 lanes (static slices + two
        # vectorized compares).  No gather, no (2B,2B) mask matrix.
        c = lax.broadcasted_iota(jnp.int32, (1, n2 - 2), 1)       # (1, 2B-2)
        s0 = e[:, 0:n2 - 2]
        s1 = e[:, 1:n2 - 1]
        s2 = e[:, 2:n2]
        neg_t = jnp.where(c < k, s0, jnp.where(c < k + (b - 1), s1, s2))
        neg_ref[...] = neg_t                          # (tm, 2B-2)
        pos_ref[...] = pos_t                          # (tm, 1)
        ng = jnp.sum(neg_t, axis=-1, keepdims=True)
    else:
        # Loss-only path: no neg/pos HBM writeback and no compaction.  Zero
        # the two masked columns and row-sum; sums exactly the same 2B-2
        # values as the compacted path (no cancellation).
        c2 = lax.broadcasted_iota(jnp.int32, (1, n2), 1)          # (1, 2B)
        drop = (c2 == k) | (c2 == k + b)
        ng = jnp.sum(jnp.where(drop, 0.0, e), axis=-1, keepdims=True)

    loss_terms = -jnp.log(pos_t / (ng + pos_t))       # (tm, 1)
    loss_part = jnp.sum(loss_terms)
    pos_part = jnp.sum(pos_t)
    neg_part = jnp.sum(ng)

    # Lane-dense (8,128) stats block: [loss_sum, pos_sum, neg_sum] in lanes
    # 0..2 of sublane 0; a plain sum over tiles folds them in the wrapper.
    sub = lax.broadcasted_iota(jnp.int32, (8, 128), 0)
    lane = lax.broadcasted_iota(jnp.int32, (8, 128), 1)
    row0 = sub == 0
    stats = (jnp.where(row0 & (lane == 0), loss_part, 0.0)
             + jnp.where(row0 & (lane == 1), pos_part, 0.0)
             + jnp.where(row0 & (lane == 2), neg_part, 0.0))
    stats_ref[...] = stats.astype(jnp.float32)


def _vmem_capacity_bytes():
    """Per-core VMEM capacity; conservative (v7x-safe) fallback."""
    try:
        cap = int(pltpu.get_tpu_info().vmem_capacity_bytes)
        if cap > 0:
            return cap
    except Exception:
        pass
    return 64 * 1024 * 1024


def _estimate_vmem_bytes(tm, n2, d, feats_itemsize, return_pairs):
    """Peak VMEM working set for one grid step (generous, per review)."""
    feats = 2 * n2 * d * feats_itemsize               # resident feats, 2 buffers
    live = 7 if return_pairs else 4                   # concurrent f32 (tm,2B) blocks
    rows = live * tm * n2 * 4
    outs = (2 * tm * (n2 - 2) * 4 + 2 * tm * 4) if return_pairs else 0
    stats = 2 * 8 * 128 * 4
    scratch = 2 << 20                                 # Mosaic internal slack
    return feats + rows + outs + stats + scratch


def _pick_tile_rows(b, n2, d, feats_itemsize, return_pairs, budget):
    """Largest tm (multiple of 8, divides B, <= 1024) whose working set fits
    the per-generation budget.  Bigger on 128 MiB parts, smaller on v7x."""
    best = 8
    t = 8
    cap = min(b, 1024)
    while t <= cap:
        if b % t == 0 and _estimate_vmem_bytes(t, n2, d, feats_itemsize,
                                               return_pairs) <= budget:
            best = t
        t += 8
    return best


def pair_con_loss(features_1, features_2, temperature=0.05, *,
                  return_pairs=True, matmul_dtype=None, tile_rows=None,
                  core_parallel=False):
    """JAX/Pallas equivalent of PairConLoss.forward (eps is unused upstream too).

    return_pairs=False is the fast training path: only loss / pos_mean /
    neg_mean are produced (no (2B, 2B-2) neg writeback).  matmul_dtype=None
    auto-selects bf16 MXU operands (f32 accumulation) on the loss-only path and
    f32 on the full-parity path; pass jnp.float32 / jnp.bfloat16 to override.
    core_parallel=True requests an explicit 2-TensorCore split (v7x).
    """
    features_1 = jnp.asarray(features_1, jnp.float32)
    features_2 = jnp.asarray(features_2, jnp.float32)
    b, d = features_1.shape
    n2 = 2 * b

    if b % 8 != 0:
        raise NotImplementedError("pair_con_loss requires batch % 8 == 0")

    if matmul_dtype is None:
        matmul_dtype = jnp.float32 if return_pairs else jnp.bfloat16
    matmul_dtype = jnp.dtype(matmul_dtype)

    vmem_cap = _vmem_capacity_bytes()
    budget = (vmem_cap * 3) // 4          # ~48 MiB on v7x, ~96 MiB on v5e/v6e

    if tile_rows is None:
        tile_rows = _pick_tile_rows(b, n2, d, matmul_dtype.itemsize,
                                    return_pairs, budget)
    assert tile_rows % 8 == 0 and b % tile_rows == 0
    n_tiles = n2 // tile_rows

    # vmem_limit sized from the real working-set estimate of the chosen tile
    # (never clamped below it), with headroom left to the physical capacity.
    est = _estimate_vmem_bytes(tile_rows, n2, d, matmul_dtype.itemsize,
                               return_pairs)
    vmem_limit = int(min(max(est, 16 * 1024 * 1024), vmem_cap - (4 << 20)))

    # One concat + one cast in XLA; the kernel never concatenates, transposes
    # or re-casts the resident (2B, D) block.
    feats = jnp.concatenate([features_1, features_2], axis=0).astype(matmul_dtype)

    kernel = functools.partial(
        _pair_con_loss_kernel, batch=b, tile_rows=tile_rows,
        inv_temp=float(1.0 / temperature), matmul_dtype=matmul_dtype,
        return_pairs=return_pairs)

    stats_sds = jax.ShapeDtypeStruct((8 * n_tiles, 128), jnp.float32)
    stats_spec = pl.BlockSpec((8, 128), lambda i: (i, 0))

    if return_pairs:
        out_shape = (
            jax.ShapeDtypeStruct((n2, n2 - 2), jnp.float32),     # neg (compacted)
            jax.ShapeDtypeStruct((n2, 1), jnp.float32),          # pos
            stats_sds,
        )
        out_specs = (
            pl.BlockSpec((tile_rows, n2 - 2), lambda i: (i, 0)),
            # NOTE: last dim 1 -> masked stores, but pos is only 2B*4 bytes;
            # the loss-only path has no such output at all.
            pl.BlockSpec((tile_rows, 1), lambda i: (i, 0)),
            stats_spec,
        )
    else:
        out_shape = stats_sds
        out_specs = stats_spec

    semantics = (pltpu.CORE_PARALLEL,) if core_parallel else ("parallel",)

    outs = pl.pallas_call(
        kernel,
        out_shape=out_shape,
        grid=(n_tiles,),
        in_specs=[pl.BlockSpec((n2, d), lambda i: (0, 0))],      # feats resident
        out_specs=out_specs,
        compiler_params=pltpu.CompilerParams(
            dimension_semantics=semantics,
            vmem_limit_bytes=vmem_limit),
    )(feats)

    if return_pairs:
        neg, pos, stats = outs
    else:
        stats = outs
        neg = pos = None

    totals = jnp.sum(stats, axis=0)                   # trivial XLA reduction
    loss = totals[0] / n2
    pos_mean = totals[1] / n2
    neg_mean = totals[2] / (n2 * (n2 - 2))

    result = {"loss": loss, "pos_mean": pos_mean, "neg_mean": neg_mean}
    if return_pairs:
        result["pos"] = pos[:, 0]
        result["neg"] = neg
    return result


def _reference(features_1, features_2, temperature=0.05):
    """Pure-JAX reference mirroring the PyTorch code, for verification."""
    b = features_1.shape[0]
    feats = jnp.concatenate([features_1, features_2], axis=0)
    mask = ~jnp.tile(jnp.eye(b, dtype=bool), (2, 2))
    pos = jnp.exp(jnp.sum(features_1 * features_2, axis=-1) / temperature)
    pos = jnp.concatenate([pos, pos], axis=0)
    neg_full = jnp.exp(feats @ feats.T / temperature)
    neg = neg_full[mask].reshape(2 * b, -1)
    ng = neg.sum(axis=-1)
    loss = jnp.mean(-jnp.log(pos / (ng + pos)))
    return loss, jnp.mean(pos), jnp.mean(neg), pos, neg


if __name__ == "__main__":
    def _make_inputs(B, D, salt):
        key = jax.random.fold_in(jax.random.PRNGKey(0), salt)
        k1, k2 = jax.random.split(key)
        # L2-normalize (standard for contrastive embeddings) so exp(./T) stays
        # finite in f32; input construction, not module semantics.
        f1 = jax.random.normal(k1, (B, D), jnp.float32)
        f2 = jax.random.normal(k2, (B, D), jnp.float32)
        f1 = f1 / jnp.linalg.norm(f1, axis=-1, keepdims=True)
        f2 = f2 / jnp.linalg.norm(f2, axis=-1, keepdims=True)
        return f1, f2

    def _check(B, D, temperature, salt):
        f1, f2 = _make_inputs(B, D, salt)
        ref_loss, ref_pm, ref_nm, ref_pos, ref_neg = _reference(f1, f2, temperature)

        # Full-parity path (f32 MXU, returns pos/neg like the PyTorch module).
        out = pair_con_loss(f1, f2, temperature=temperature,
                            return_pairs=True, matmul_dtype=jnp.float32)
        jax.block_until_ready(out["loss"])
        np.testing.assert_allclose(np.asarray(out["loss"]), np.asarray(ref_loss), rtol=1e-4)
        np.testing.assert_allclose(np.asarray(out["pos_mean"]), np.asarray(ref_pm), rtol=1e-4)
        np.testing.assert_allclose(np.asarray(out["neg_mean"]), np.asarray(ref_nm), rtol=1e-4)
        np.testing.assert_allclose(np.asarray(out["pos"]), np.asarray(ref_pos), rtol=1e-4)
        np.testing.assert_allclose(np.asarray(out["neg"]), np.asarray(ref_neg), rtol=1e-4)

        # Loss-only training path, f32: scalar parity, no pair writeback.
        out_lo = pair_con_loss(f1, f2, temperature=temperature,
                               return_pairs=False, matmul_dtype=jnp.float32)
        jax.block_until_ready(out_lo["loss"])
        np.testing.assert_allclose(np.asarray(out_lo["loss"]), np.asarray(ref_loss), rtol=1e-4)
        np.testing.assert_allclose(np.asarray(out_lo["neg_mean"]), np.asarray(ref_nm), rtol=1e-4)

        # Loss-only with the bf16 MXU auto-default: loss-level agreement only
        # (exp(./0.05) amplifies bf16 operand rounding ~20x in the exponent).
        out_bf = pair_con_loss(f1, f2, temperature=temperature, return_pairs=False)
        jax.block_until_ready(out_bf["loss"])
        np.testing.assert_allclose(np.asarray(out_bf["loss"]), np.asarray(ref_loss),
                                   rtol=5e-2, atol=5e-2)

    _check(B=8, D=32, temperature=0.05, salt=0)     # 2 row tiles of 8
    _check(B=16, D=128, temperature=0.05, salt=1)   # 2 row tiles of 16
    print("KERNEL_OK")
</pallas_src>

<mosaic_0001>
module attributes {stable_mosaic.version = 11 : i64} {
  func.func @_pair_con_loss_kernel(%arg0: i32, %arg1: memref<16x32xf32, #tpu.memory_space<vmem>>, %arg2: memref<8x14xf32, #tpu.memory_space<vmem>>, %arg3: memref<8x1xf32, #tpu.memory_space<vmem>>, %arg4: memref<8x128xf32, #tpu.memory_space<vmem>>) attributes {dimension_semantics = [#tpu.dimension_semantics<parallel>], iteration_bounds = array<i64: 2>, scalar_prefetch = 0 : i64, scratch_operands = 0 : i64, tpu.core_type = #tpu.core_type<tc>, window_params = [{pipeline_mode = #tpu.pipeline_mode<synchronous>, transform_indices = @transform_0, window_bounds = array<i64: 16, 32>}, {transform_indices = @transform_1, window_bounds = array<i64: 8, 14>}, {transform_indices = @transform_2, window_bounds = array<i64: 8, 1>}, {transform_indices = @transform_3, window_bounds = array<i64: 8, 128>}]} {
    %c8_i32 = arith.constant 8 : i32
    %0 = arith.muli %arg0, %c8_i32 : i32
    %1 = tpu.assume_multiple %0, 8 : i32
    %c8_i32_0 = arith.constant 8 : i32
    %2 = arith.cmpi slt, %1, %c8_i32_0 : i32
    %c8_i32_1 = arith.constant 8 : i32
    %3 = arith.subi %1, %c8_i32_1 : i32
    %4 = arith.select %2, %1, %3 : i32
    %c8_i32_2 = arith.constant 8 : i32
    %5 = arith.addi %1, %c8_i32_2 : i32
    %c8_i32_3 = arith.constant 8 : i32
    %6 = arith.subi %1, %c8_i32_3 : i32
    %7 = arith.select %2, %5, %6 : i32
    %8 = tpu.assume_multiple %7, 8 : i32
    %9 = arith.index_cast %1 : i32 to index
    %c0 = arith.constant 0 : index
    %10 = vector.load %arg1[%9, %c0] : memref<16x32xf32, #tpu.memory_space<vmem>>, vector<8x32xf32>
    %11 = arith.index_cast %8 : i32 to index
    %c0_4 = arith.constant 0 : index
    %12 = vector.load %arg1[%11, %c0_4] : memref<16x32xf32, #tpu.memory_space<vmem>>, vector<8x32xf32>
    %cst = arith.constant 2.000000e+01 : f32
    %13 = vector.broadcast %cst : f32 to vector<8x32xf32>
    %14 = arith.mulf %10, %13 : vector<8x32xf32>
    %15 = arith.mulf %14, %12 : vector<8x32xf32>
    %cst_5 = arith.constant dense<0.000000e+00> : vector<8xf32>
    %16 = vector.multi_reduction <add>, %15, %cst_5 [1] : vector<8x32xf32> to vector<8xf32>
    %17 = vector.shape_cast %16 : vector<8xf32> to vector<8x1xf32>
    %18 = math.exp %17 : vector<8x1xf32>
    %c0_6 = arith.constant 0 : index
    %c0_7 = arith.constant 0 : index
    %19 = vector.load %arg1[%c0_6, %c0_7] : memref<16x32xf32, #tpu.memory_space<vmem>>, vector<16x32xf32>
    %cst_8 = arith.constant dense<0.000000e+00> : vector<8x16xf32>
    %20 = tpu.matmul %14, %19, %cst_8 {dimension_numbers = #tpu.dot_dimension_numbers<[1], [1], [0], [0], [0, 0, 1, 0], [], []>} : vector<8x32xf32>, vector<16x32xf32>, vector<8x16xf32> -> vector<8x16xf32>
    %21 = math.exp %20 : vector<8x16xf32>
    %22 = tpu.iota {dimensions = array<i32: 0>} : vector<8x1xi32>
    %23 = vector.broadcast %4 : i32 to vector<8x1xi32>
    %24 = arith.addi %23, %22 : vector<8x1xi32>
    %25 = tpu.iota {dimensions = array<i32: 1>} : vector<1x14xi32>
    %26 = vector.extract_strided_slice %21 {offsets = [0, 0], sizes = [8, 14], strides = [1, 1]} : vector<8x16xf32> to vector<8x14xf32>
    %27 = vector.extract_strided_slice %21 {offsets = [0, 1], sizes = [8, 14], strides = [1, 1]} : vector<8x16xf32> to vector<8x14xf32>
    %28 = vector.extract_strided_slice %21 {offsets = [0, 2], sizes = [8, 14], strides = [1, 1]} : vector<8x16xf32> to vector<8x14xf32>
    %29 = vector.broadcast %25 : vector<1x14xi32> to vector<8x14xi32>
    %30 = vector.broadcast %24 : vector<8x1xi32> to vector<8x14xi32>
    %31 = arith.cmpi slt, %29, %30 : vector<8x14xi32>
    %c7_i32 = arith.constant 7 : i32
    %32 = vector.broadcast %c7_i32 : i32 to vector<8x1xi32>
    %33 = arith.addi %24, %32 : vector<8x1xi32>
    %34 = vector.broadcast %25 : vector<1x14xi32> to vector<8x14xi32>
    %35 = vector.broadcast %33 : vector<8x1xi32> to vector<8x14xi32>
    %36 = arith.cmpi slt, %34, %35 : vector<8x14xi32>
    %37 = arith.select %36, %27, %28 : vector<8x14xi1>, vector<8x14xf32>
    %38 = arith.select %31, %26, %37 : vector<8x14xi1>, vector<8x14xf32>
    %c0_9 = arith.constant 0 : index
    %c0_10 = arith.constant 0 : index
    %39 = vector.load %arg2[%c0_9, %c0_10] : memref<8x14xf32, #tpu.memory_space<vmem>>, vector<8x14xf32>
    tpu.vector_store %arg2[%c0_9, %c0_10], %38 {strides = array<i32>} : memref<8x14xf32, #tpu.memory_space<vmem>>, vector<8x14xf32>,
    %c0_11 = arith.constant 0 : index
    %c0_12 = arith.constant 0 : index
    %40 = vector.load %arg3[%c0_11, %c0_12] : memref<8x1xf32, #tpu.memory_space<vmem>>, vector<8x1xf32>
    tpu.vector_store %arg3[%c0_11, %c0_12], %18 {strides = array<i32>} : memref<8x1xf32, #tpu.memory_space<vmem>>, vector<8x1xf32>,
    %cst_13 = arith.constant dense<0.000000e+00> : vector<8xf32>
    %41 = vector.multi_reduction <add>, %38, %cst_13 [1] : vector<8x14xf32> to vector<8xf32>
    %42 = vector.shape_cast %41 : vector<8xf32> to vector<8x1xf32>
    %43 = arith.addf %42, %18 : vector<8x1xf32>
    %44 = arith.divf %18, %43 : vector<8x1xf32>
    %45 = math.log %44 : vector<8x1xf32>
    %cst_14 = arith.constant 0.000000e+00 : f32
    %46 = vector.broadcast %cst_14 : f32 to vector<8x1xf32>
    %47 = arith.subf %46, %45 : vector<8x1xf32>
    %48 = vector.shape_cast %47 : vector<8x1xf32> to vector<1x8x1xf32>
    %cst_15 = arith.constant dense<0.000000e+00> : vector<1xf32>
    %49 = vector.multi_reduction <add>, %48, %cst_15 [1, 2] : vector<1x8x1xf32> to vector<1xf32>
    %50 = vector.shape_cast %49 : vector<1xf32> to vector<1x1x1xf32>
    %51 = vector.extract %50[0, 0, 0] : f32 from vector<1x1x1xf32>
    %52 = vector.shape_cast %18 : vector<8x1xf32> to vector<1x8x1xf32>
    %cst_16 = arith.constant dense<0.000000e+00> : vector<1xf32>
    %53 = vector.multi_reduction <add>, %52, %cst_16 [1, 2] : vector<1x8x1xf32> to vector<1xf32>
    %54 = vector.shape_cast %53 : vector<1xf32> to vector<1x1x1xf32>
    %55 = vector.extract %54[0, 0, 0] : f32 from vector<1x1x1xf32>
    %56 = vector.shape_cast %42 : vector<8x1xf32> to vector<1x8x1xf32>
    %cst_17 = arith.constant dense<0.000000e+00> : vector<1xf32>
    %57 = vector.multi_reduction <add>, %56, %cst_17 [1, 2] : vector<1x8x1xf32> to vector<1xf32>
    %58 = vector.shape_cast %57 : vector<1xf32> to vector<1x1x1xf32>
    %59 = vector.extract %58[0, 0, 0] : f32 from vector<1x1x1xf32>
    %60 = tpu.iota {dimensions = array<i32: 0>} : vector<8x128xi32>
    %61 = tpu.iota {dimensions = array<i32: 1>} : vector<8x128xi32>
    %c0_i32 = arith.constant 0 : i32
    %62 = vector.broadcast %c0_i32 : i32 to vector<8x128xi32>
    %63 = arith.cmpi eq, %60, %62 : vector<8x128xi32>
    %c0_i32_18 = arith.constant 0 : i32
    %64 = vector.broadcast %c0_i32_18 : i32 to vector<8x128xi32>
    %65 = arith.cmpi eq, %61, %64 : vector<8x128xi32>
    %66 = arith.andi %63, %65 : vector<8x128xi1>
    %cst_19 = arith.constant 0.000000e+00 : f32
    %67 = vector.broadcast %51 : f32 to vector<8x128xf32>
    %68 = vector.broadcast %cst_19 : f32 to vector<8x128xf32>
    %69 = arith.select %66, %67, %68 : vector<8x128xi1>, vector<8x128xf32>
    %c1_i32 = arith.constant 1 : i32
    %70 = vector.broadcast %c1_i32 : i32 to vector<8x128xi32>
    %71 = arith.cmpi eq, %61, %70 : vector<8x128xi32>
    %72 = arith.andi %63, %71 : vector<8x128xi1>
    %cst_20 = arith.constant 0.000000e+00 : f32
    %73 = vector.broadcast %55 : f32 to vector<8x128xf32>
    %74 = vector.broadcast %cst_20 : f32 to vector<8x128xf32>
    %75 = arith.select %72, %73, %74 : vector<8x128xi1>, vector<8x128xf32>
    %76 = arith.addf %69, %75 : vector<8x128xf32>
    %c2_i32 = arith.constant 2 : i32
    %77 = vector.broadcast %c2_i32 : i32 to vector<8x128xi32>
    %78 = arith.cmpi eq, %61, %77 : vector<8x128xi32>
    %79 = arith.andi %63, %78 : vector<8x128xi1>
    %cst_21 = arith.constant 0.000000e+00 : f32
    %80 = vector.broadcast %59 : f32 to vector<8x128xf32>
    %81 = vector.broadcast %cst_21 : f32 to vector<8x128xf32>
    %82 = arith.select %79, %80, %81 : vector<8x128xi1>, vector<8x128xf32>
    %83 = arith.addf %76, %82 : vector<8x128xf32>
    %c0_22 = arith.constant 0 : index
    %c0_23 = arith.constant 0 : index
    %84 = vector.load %arg4[%c0_22, %c0_23] : memref<8x128xf32, #tpu.memory_space<vmem>>, vector<8x128xf32>
    tpu.vector_store %arg4[%c0_22, %c0_23], %83 {strides = array<i32>} : memref<8x128xf32, #tpu.memory_space<vmem>>, vector<8x128xf32>,
    return
  }
  func.func @transform_0(%arg0: i32) -> (i32, i32) {
    %c0_i32 = arith.constant 0 : i32
    %c0_i32_0 = arith.constant 0 : i32
    %c0_i32_1 = arith.constant 0 : i32
    return %c0_i32, %c0_i32_0 : i32, i32
  }
  func.func @transform_1(%arg0: i32) -> (i32, i32) {
    %c0_i32 = arith.constant 0 : i32
    %c0_i32_0 = arith.constant 0 : i32
    return %arg0, %c0_i32 : i32, i32
  }
  func.func @transform_2(%arg0: i32) -> (i32, i32) {
    %c0_i32 = arith.constant 0 : i32
    %c0_i32_0 = arith.constant 0 : i32
    return %arg0, %c0_i32 : i32, i32
  }
  func.func @transform_3(%arg0: i32) -> (i32, i32) {
    %c0_i32 = arith.constant 0 : i32
    %c0_i32_0 = arith.constant 0 : i32
    return %arg0, %c0_i32 : i32, i32
  }
}

</mosaic_0001>

<bundles_post_ra>
// kernel: tpu_custom_call.1
= control target key start
LH: loop header
LB: loop body
LE: loop exit
PB: predicated region body
PF: predicated region fallthrough
CT: control target
= control target key end

     0   :  { %9 = vsyncpa [#allocation3], 0  ;;  %s977_s0 = inlined_call_operand.hbm [shape: f32[16,32], index: 0, kind: input, shape index: {}]   ;;  %s978_s1 = inlined_call_operand.hbm [shape: f32[16,14], index: 1, kind: output, shape index: {0}]   ;;  %s979_s2 = inlined_call_operand.vmem [shape: f32[16,1], index: 2, kind: output, shape index: {1}]   ;;  %s980_s3 = inlined_call_operand.hbm [shape: f32[16,128], index: 3, kind: output, shape index: {2}]  }
   0x1   :  { %10 = vsyncpa [#allocation4], 0 }
   0x2   :  { %12 = vsyncpa [#allocation4 + $0x1], 0 }
   0x3   :  { %13 = vsyncpa [#allocation7], 0 }
   0x4   :  { %15 = vsyncpa [#allocation7 + $0x1], 0  ;;  %s787_s12 = smov 0   ;;  %s789_s13 = smov 0  }
   0x5   :  { %s791_s14 = smov 0   ;;  %s793_s15 = smov 0  }
   0x6 LB: > { %s808_s16 = sadd.s32 4294967295, %s755_s15   ;;  %s520_s17 = sadd.s32 4294967294, %s755_s15   ;;  %s755_s15 = sphi %s793_s15, %s996_s15   ;;  %s751_s14 = sphi %s791_s14, %s995_s14   ;;  %s747_s13 = sphi %s789_s13, %s994_s13   ;;  %s743_s12 = sphi %s787_s12, %s993_s12  }
   0x7   : > { %s812_s18 = sadd.s32 1, %s755_s15   ;;  %s49_s19 = sadd.s32 1, %s751_s14 }
   0x8   : > { %s46_s20 = ssub.s32 %s755_s15, %s812_s18  ;;  %p59_p0 = scmp.ne.s32.totalorder %s751_s14, %s747_s13 }
   0x9   : > { %p47_p1 = scmp.eq.s32.totalorder %s46_s20, 0  ;;  %p60_p2 = scmp.eq.s32.totalorder %s808_s16, 1 }
   0xa   : > { %p65_p3 = scmp.ne.s32.totalorder %s747_s13, %s743_s12  ;;  %p66_p4 = scmp.eq.s32.totalorder %s520_s17, 1 }
   0xb   : > { %s823_s21 = scalar_select %p47_p1, %s751_s14, %s49_s19  }
   0xc   : > { %p825_p5 = por %p60_p2, %p59_p0  ;;  %p829_p6 = por %p66_p4, %p65_p3 }
   0xd   : > { %p521_p7 = scmp.ge.s32.totalorder %s755_s15, 1  ;;  %p125_p8 = scmp.lt.s32.totalorder %s755_s15, 3 }
   0xe   : > { %s984_s22 = scalar_select %p825_p5, 1, 0 }
   0xf   : > { %s985_s23 = scalar_select %p829_p6, 1, 0 }
  0x10   : > { %p981_p9 = scmp.eq.s32.totalorder %s808_s16, 0  ;;  %p836_p10 = pnand %p521_p7, %p125_p8 }
  0x11   : > { %s757_s25 = smov [#allocation2]   ;;  %s629_s30 = scalar_lea.hbm %s977_s0, 256 }
  0x12   : > { %s986_s24 = scalar_select %p836_p10, 1, 0 }
  0x13   : > { %s137_s26 = sshll.u32 %s757_s25, 4  ;;  %p567_p11 = pneg %p836_p10  ;;  %s138_s26 = int_to_ptr.vmem [resolvable:$true] %s137_s26 }
  0x14   : > { %p630_p13 = scmp.ne.s32.totalorder %s977_s0, %s629_s30  ;;  %p636_p3 = scmp.lt.u32.totalorder %s629_s30, %s977_s0 }
  0x15   : > { %p844_p12 = pnand %p981_p9, %p567_p11 }
  0x17   : > { %p631_p0 = pneg %p844_p12 }
  0x19   : > { %p632_p1 = pnand %p631_p0, %p630_p13 }
  0x1b   : > { %p633_p2 = pneg %p632_p1 }
  0x1d   : > { %p638_p4 = pnand %p636_p3, %p633_p2 }
  0x1f   : > { %641 = shalt.err (!%p638_p4)
}
  0x20   : > { %s642_s8 = scalar_lea.vmem %s138_s26, 256  ;;  %p650_p9 = scmp.lt.s32.totalorder %s138_s26, %s138_s26 }
  0x21   : > { %p643_p7 = scmp.ne.s32.totalorder %s138_s26, %s642_s8  ;;  %p651_p6 = scmp.lt.s32.totalorder %s642_s8, %s642_s8 }
  0x23   : > { %p645_p8 = pnand %p643_p7, %p631_p0  ;;  %p652_p5 = por %p651_p6, %p650_p9 }
  0x25   : > { %p646_p11 = pneg %p645_p8 }
  0x27   : > { %p653_p10 = pnand %p652_p5, %p646_p11 }
  0x29   : > { %656 = shalt.err (!%p653_p10)
}
  0x2a   : > { %s758_s9 = smov 128   ;;  %s759_s10 = smov 8  }
  0x2b   : > { %570 = dma.hbm_to_vmem [thread:$0]  (!%p844_p12), %s977_s0, 256, %s138_s26, [#allocation3], %s758_s9, %s758_s9, %s759_s10  }
  0x2c   : > { %p988_p13 = scmp.ne.s32.totalorder %s986_s24, 0 }
  0x2d   : > { %p989_p1 = scmp.eq.s32.totalorder (!%p988_p13), %s808_s16, 0 }
  0x2e   : > { %153 = sbr.rel (%p988_p13) target bundleno = 810 (0x32a), region = 24 }
  0x35   : > { %730 = dma.done.wait (%p989_p1), [#allocation3], 256   ;;  %p990_p0 = pmov %p989_p1 }
  0x36   : > { %v760_v0 = vmov 0.0|0.0   ;;  %vm761_vm0 = vmmov 0   ;;  %v762_v1 = vmov 0.0   ;;  %vm197_vm1 = vcmask 261120   ;;  %s528_s19 = sshll.u32 %s808_s16, 3  ;;  %v203_v2 = vld [vmem:[#allocation2] sm:$0xff] }
  0x37   : > { %732 = vsyncadd (%p990_p0), [#allocation3], 4294967040  ;;  %549 = vmatprep.subr.bf16.mxu0 %v760_v0  ;;  %546 = vmatprep.mubr.msk.f32.mxu0 %vm761_vm0, %v762_v1  ;;  %v204_v3 = vld [vmem:[#allocation2 + $0x8] sm:$0xff]  ;;  %s191_s20 = scalar_lea.vmem [#allocation2], %s528_s19  ;;  %p186_p5 = scmp.lt.s32.totalorder %s528_s19, 8  ;;  %vm306_vm3 = vcmask 7168   ;;  %v286_v17 = vlaneseq }
  0x38   : > { %vm551_vm2 = vmpackc.low %vm197_vm1, %vm197_vm1  ;;  %v550_v4 = vpack.c.bf16 %v204_v3, %v203_v2  ;;  %v192_v5 = vld [vmem:[%s191_s20] sm:$0xff]  ;;  %s529_s24 = sadd.s32 4294967288, %s528_s19  ;;  %s189_s25 = sadd.s32 8, %s528_s19  ;;  %vm304_vm6 = vcmask 113664  }
  0x39   : > { %v195_v6 = vmul.f32 20.0, %v192_v5  ;;  %s998_s19 = smov (!%p186_p5, %s528_s19), %s529_s24  ;;  %s1000_s25 = smov (!%p186_p5, %s189_s25), %s529_s24  ;;  %v881_v18 = vshrl.u32 %v286_v17, 7  ;;  %v884_v21 = vand.u32 127, %v286_v17 }
  0x3a   : > { %552 = vmatpush3.bf16.xpose.msk.msra.mxu0 %vm551_vm2, %v550_v4  ;;  %s193_s26 = scalar_lea.vmem [#allocation2], %s1000_s25  ;;  %s763_s27 = smov 127   ;;  %v288_v19 = vstv %s998_s19 }
  0x3b   : > { %v194_v7 = vld [vmem:[%s193_s26] sm:$0xff]  ;;  %s764_s28 = smov 126   ;;  %p181_p6 = scmp.lt.s32.totalorder %s808_s16, 1  ;;  %v289_v20 = vadd.s32 %v288_v19, %v881_v18 }
  0x3c   : > { %v196_v8 = vmul.f32 %v195_v6, %v194_v7  ;;  %s887_s7 = sand.u32 1, %s747_s13   ;;  %s535_s10 = sshll.u32 %s808_s16, 7 }
  0x3d   : > { %s182_s29 = scalar_select %p181_p6, %s808_s16, 1  ;;  %v293_v22 = vadd.s32 7, %v289_v20  ;;  %vm292_vm5 = vcmp.lt.s32.totalorder %v884_v21, %v289_v20 }
  0x3e   : > { %v198_v9 = vsel %vm197_vm1, %v196_v8, 0.0  ;;  %s525_s8 = sshll.u32 %s887_s7, 3  ;;  %s903_s19 = scalar_lea.hbm %s978_s1, %s535_s10 }
  0x3f   : > { %199 = vadd.xlane.f32.xlu1 %v198_v9  ;;  %s527_s30 = sshll.u32 %s182_s29, 3  ;;  %vm294_vm4 = vcmp.lt.s32.totalorder %v884_v21, %v293_v22  ;;  %s167_s9 = scalar_lea.vmem [#allocation5], %s525_s8 }
  0x40   : > { %s184_s6 = scalar_lea.vmem %s979_s2, %s527_s30  ;;  %s386_s20 = sshll.u32 %s167_s9, 4  ;;  %s387_s20 = int_to_ptr.vmem [resolvable:$true] %s386_s20 }
  0x41   : > { %547 = vmatmul.mubr.msk.f32.vlgmr.msra.gmra.mrb[0].mxu0 %vm197_vm1, %v195_v6  ;;  %s364_s24 = scalar_lea.sflag [#allocation4], %s887_s7  ;;  %s657_s25 = scalar_lea.vmem %s387_s20, 128 }
  0x42   : > { %p658_p9 = scmp.ne.s32.totalorder %s387_s20, %s657_s25  ;;  %p991_p10 = scmp.ne.s32.totalorder %s984_s22, 0 }
  0x43   : > { %s765_s26 = smov [#allocation5]  }
  0x44   : > { %p659_p12 = pnand %p658_p9, %p991_p10 }
  0x46   : > { %p660_p2 = pneg %p659_p12 }
  0xcc   : > { %v200_v14 = vpop.xlane.xlu1 %199 }
  0xcd   : > { %v201_v15 = vmul.f32 1.442695, %v200_v14 }
 0x114   : > { %v280_v10 = vpop.f32.mrb[0].mxu0 }
 0x115   : > { %v284_v11 = vmul.f32 1.442695, %v280_v10  ;;  %v548_v12 = vpop.f32.mrb[1].mxu0 }
 0x117   : > { %621 = vpow2.f32 %v284_v11 }
 0x118   : > { %623 = vpow2.f32 %v201_v15 }
 0x121   : > { %v622_v13 = vpop.eup %621 }
 0x122   : > { %296 = vrot.lane.b32.xlu0 %v622_v13, %s763_s27  ;;  %v624_v16 = vpop.eup %623  ;;  %s661_s27 = sshll.u32 %s765_s26, 4  ;;  %s662_s27 = int_to_ptr.vmem [resolvable:$false] %s661_s27 }
 0x123   : > { %307 = vst.msk [vmem:[%s184_s6] sm:$0xff] %vm306_vm3, %v624_v16  ;;  %v327_v28 = vsel %vm306_vm3, %v624_v16, 0.0  ;;  %p664_p3 = scmp.lt.s32.totalorder %s387_s20, %s662_s27 }
 0x126   : > { %299 = vrot.lane.b32.xlu0 %v622_v13, %s764_s28  ;;  %s663_s28 = scalar_lea.vmem %s662_s27, 256 }
 0x127   : > { %p665_p4 = scmp.lt.s32.totalorder %s663_s28, %s657_s25 }
 0x129   : > { %p666_p7 = por %p665_p4, %p664_p3 }
 0x12b   : > { %p667_p8 = pnand %p666_p7, %p660_p2 }
 0x194   : > { %v297_v23 = vpop.permute.xlu0 %296 }
 0x198   : > { %v300_v24 = vpop.permute.xlu0 %299 }
 0x199   : > { %v302_v25 = vsel %vm294_vm4, %v297_v23, %v300_v24 }
 0x19a   : > { %v303_v26 = vsel %vm292_vm5, %v622_v13, %v302_v25 }
 0x19b   : > { %305 = vst.msk [vmem:[%s167_s9] sm:$0xff] %vm304_vm6, %v303_v26  ;;  %v308_v27 = vsel %vm304_vm6, %v303_v26, 0.0 }
 0x19c   : > { %309 = vadd.xlane.f32.xlu1 %v308_v27 }
 0x1a0   : > { %328 = vadd.xlane.f32.xlu1 %v327_v28 }
 0x229   : > { %v310_v29 = vpop.xlane.xlu1 %309 }
 0x22a   : > { %v311_v30 = vadd.f32 %v624_v16, %v310_v29  ;;  %v337_v31 = vsel %vm306_vm3, %v310_v29, 0.0 }
 0x22b   : > { %338 = vadd.xlane.f32.xlu1 %v337_v31 }
 0x22c   : > { %625 = vrcp.f32 %v311_v30 }
 0x236   : > { %v626_v32 = vpop.eup %625 }
 0x237   : > { %v313_v33 = vmul.f32 %v626_v32, %v624_v16 }
 0x239   : > { %627 = vlog2.f32 %v313_v33 }
 0x243   : > { %v628_v34 = vpop.eup %627 }
 0x244   : > { %v315_v35 = vmul.f32 0.6931472, %v628_v34 }
 0x246   : > { %v316_v36 = vsub.f32 0.0, %v315_v35 }
 0x248   : > { %v317_v37 = vsel %vm306_vm3, %v316_v36, 0.0 }
 0x249   : > { %318 = vadd.xlane.f32.xlu0 %v317_v37 }
 0x24a   : > { %670 = shalt.err (!%p667_p8)
}
 0x24b   : > { %s671_s29 = scalar_lea.hbm %s903_s19, 128  ;;  %s675_s5 = scalar_lea.hbm %s978_s1, 256 }
 0x24c   : > { %p672_p11 = scmp.ne.s32.totalorder %s903_s19, %s671_s29  ;;  %p676_p0 = scmp.lt.u32.totalorder %s903_s19, %s978_s1 }
 0x24d   : > { %p677_p5 = scmp.lt.u32.totalorder %s675_s5, %s671_s29  ;;  %p679_p9 = scmp.lt.u32.totalorder %s671_s29, %s903_s19 }
 0x24e   : > { %p673_p13 = pnand %p672_p11, %p991_p10 }
 0x24f   : > { %p678_p6 = por %p677_p5, %p676_p0 }
 0x250   : > { %p674_p1 = pneg %p673_p13 }
 0x251   : > { %p680_p12 = por %p679_p9, %p678_p6 }
 0x253   : > { %p681_p2 = pnand %p680_p12, %p674_p1 }
 0x255   : > { %684 = shalt.err (!%p681_p2)
}
 0x256   : > { %563 = dma.vmem_to_hbm [thread:$0]  (%p991_p10), %s387_s20, 128, %s903_s19, %s364_s24   ;;  %v329_v38 = vpop.xlane.xlu1 %328  ;;  %vm347_vm7 = vcmp.eq.s32.totalorder %v881_v18, 0  ;;  %vm348_vm8 = vcmp.eq.s32.totalorder %v884_v21, 0  ;;  %vm352_vm9 = vcmp.eq.s32.totalorder %v884_v21, 1  ;;  %vm357_vm11 = vcmp.eq.s32.totalorder %v884_v21, 2 }
 0x257   : > { %v330_v40 = vrot.slane %v329_v38, 4  ;;  %vm349_vm10 = vmand %vm347_vm7, %vm348_vm8  ;;  %s180_s20 = scalar_lea.vmem [#allocation6], %s525_s8  ;;  %s934_s27 = scalar_lea.hbm %s980_s3, %s535_s10 }
 0x258   : > { %vm353_vm12 = vmand %vm347_vm7, %vm352_vm9  ;;  %s402_s24 = sshll.u32 %s180_s20, 4  ;;  %s373_s28 = scalar_lea.sflag [#allocation7], %s887_s7  ;;  %s936_s24 = int_to_ptr.vmem [resolvable:$true] %s402_s24 }
 0x259   : > { %v331_v42 = vadd.f32 %v330_v40, %v329_v38  ;;  %vm358_vm13 = vmand %vm347_vm7, %vm357_vm11  ;;  %s685_s29 = scalar_lea.vmem %s936_s24, 128  ;;  %s766_s8 = smov [#allocation6]  }
 0x25a   : > { %p686_p3 = scmp.ne.s32.totalorder %s936_s24, %s685_s29  ;;  %s689_s30 = sshll.u32 %s766_s8, 4  ;;  %s690_s30 = int_to_ptr.vmem [resolvable:$false] %s689_s30 }
 0x25b   : > { %v332_v44 = vrot.slane %v331_v42, 2  ;;  %s691_s16 = scalar_lea.vmem %s690_s30, 256  ;;  %p692_p8 = scmp.lt.s32.totalorder %s936_s24, %s690_s30 }
 0x25c   : > { %p687_p4 = pnand %p686_p3, %p991_p10  ;;  %p693_p11 = scmp.lt.s32.totalorder %s691_s16, %s685_s29 }
 0x25d   : > { %v333_v49 = vadd.f32 %v332_v44, %v331_v42 }
 0x25e   : > { %p688_p7 = pneg %p687_p4  ;;  %p694_p13 = por %p693_p11, %p692_p8 }
 0x25f   : > { %v334_v53 = vrot.slane %v333_v49, 1 }
 0x260   : > { %p695_p1 = pnand %p694_p13, %p688_p7 }
 0x261   : > { %v335_v57 = vadd.f32 %v334_v53, %v333_v49 }
 0x2b8   : > { %v339_v39 = vpop.xlane.xlu1 %338 }
 0x2b9   : > { %v340_v41 = vrot.slane %v339_v39, 4 }
 0x2bb   : > { %v341_v43 = vadd.f32 %v340_v41, %v339_v39 }
 0x2bd   : > { %v342_v46 = vrot.slane %v341_v43, 2 }
 0x2bf   : > { %v343_v50 = vadd.f32 %v342_v46, %v341_v43 }
 0x2c1   : > { %v344_v55 = vrot.slane %v343_v50, 1 }
 0x2c3   : > { %v345_v58 = vadd.f32 %v344_v55, %v343_v50 }
 0x2d6   : > { %v319_v45 = vpop.xlane.xlu0 %318 }
 0x2d7   : > { %v320_v47 = vrot.slane %v319_v45, 4 }
 0x2d9   : > { %v321_v48 = vadd.f32 %v320_v47, %v319_v45 }
 0x2db   : > { %v322_v51 = vrot.slane %v321_v48, 2 }
 0x2dd   : > { %v323_v52 = vadd.f32 %v322_v51, %v321_v48 }
 0x2df   : > { %v324_v54 = vrot.slane %v323_v52, 1 }
 0x2e1   : > { %v325_v56 = vadd.f32 %v324_v54, %v323_v52 }
 0x2e3   : > { %553 = vpush %v325_v56 }
 0x2e4   : > { %555 = vpush %v335_v57 }
 0x2e5   : > { %557 = vpush %v345_v58 }
 0x314   : > { %s554_s11 = spop %553 }
 0x315   : > { %v350_v59 = vstv %s554_s11  ;;  %s556_s17 = spop %555 }
 0x316   : > { %v351_v60 = vsel %vm349_vm10, %v350_v59, 0.0  ;;  %v354_v61 = vstv %s556_s17  ;;  %s558_s19 = spop %557 }
 0x317   : > { %v355_v62 = vsel %vm353_vm12, %v354_v61, 0.0  ;;  %v359_v63 = vstv %s558_s19 }
 0x318   : > { %v356_v0 = vadd.f32 %v355_v62, %v351_v60  ;;  %v360_v1 = vsel %vm358_vm13, %v359_v63, 0.0 }
 0x31a   : > { %v361_v2 = vadd.f32 %v360_v1, %v356_v0 }
 0x31c   : > { %362 = vst [vmem:[%s180_s20] sm:$0xff] %v361_v2 }
 0x31d   : > { %698 = shalt.err (!%p695_p1)
}
 0x31e   : > { %s699_s7 = scalar_lea.hbm %s934_s27, 128  ;;  %s703_s5 = scalar_lea.hbm %s980_s3, 256 }
 0x31f   : > { %p700_p0 = scmp.ne.s32.totalorder %s934_s27, %s699_s7  ;;  %p704_p9 = scmp.lt.u32.totalorder %s934_s27, %s980_s3 }
 0x320   : > { %p705_p12 = scmp.lt.u32.totalorder %s703_s5, %s699_s7  ;;  %p707_p3 = scmp.lt.u32.totalorder %s699_s7, %s934_s27 }
 0x321   : > { %p701_p5 = pnand %p700_p0, %p991_p10 }
 0x322   : > { %p706_p2 = por %p705_p12, %p704_p9 }
 0x323   : > { %p702_p6 = pneg %p701_p5 }
 0x324   : > { %p708_p4 = por %p707_p3, %p706_p2 }
 0x326   : > { %p709_p7 = pnand %p708_p4, %p702_p6 }
 0x328   : > { %712 = shalt.err (!%p709_p7)
}
 0x329   : > { %564 = dma.vmem_to_hbm [thread:$0]  (%p991_p10), %s936_s24, 128, %s934_s27, %s373_s28  }
 0x32a PF: > { %p580_p8 = scmp.ge.s32.totalorder %s755_s15, 2  ;;  %s414_s11 = sand.u32 1, %s743_s12  }
 0x32b   : > { %p992_p11 = scmp.ne.s32.totalorder %s985_s23, 0  ;;  %s415_s17 = scalar_lea.sflag [#allocation4], %s414_s11 }
 0x32d   : > { %p572_p13 = pnand %p580_p8, %p992_p11 }
 0x32f   : > { %734 = dma.done.wait (!%p572_p13), %s415_s17, 128  }
 0x330   : > { %736 = vsyncadd (!%p572_p13), %s415_s17, 4294967168  ;;  %s431_s19 = scalar_lea.sflag [#allocation7], %s414_s11 }
 0x331   : > { %738 = dma.done.wait (!%p572_p13), %s431_s19, 128  }
 0x332   : > { %740 = vsyncadd (!%p572_p13), %s431_s19, 4294967168  ;;  %p18_p10 = scmp.ge.s32.totalorder %s812_s18, 4   ;;  %s993_s12 = smov %s747_s13 }
 0x333   : > { %s994_s13 = smov %s751_s14  ;;  %s995_s14 = smov %s823_s21 }
 0x334   : > { %s996_s15 = smov %s812_s18  ;;  %20 = sbr.rel (!%p18_p10) target bundleno = 6 (0x6), region = 92 }
 0x33b   :  { %436 = vsyncpa [#allocation3], 1 }
 0x33c   :  { %438 = vsyncpa [#allocation3 + $0x1], 1 }
 0x33d   :  { %439 = vsyncpa [#allocation4], 1 }
 0x33e   :  { %441 = vsyncpa [#allocation4 + $0x1], 1 }
 0x33f   :  { %442 = vsyncpa [#allocation7], 1 }
 0x340   :  { %444 = vsyncpa [#allocation7 + $0x1], 1 }

</bundles_post_ra>
